<compile_context>
chip_gen: v7x
topology: tpu7x:2x2x1
jax: 0.10.0
libtpu: 0.0.40
codegen_flags: <defaults>
</compile_context>

<pallas_src>
import functools
import math

import jax
import jax.numpy as jnp
from jax.experimental import pallas as pl
from jax.experimental.pallas import tpu as pltpu


def lhn_kernel(*refs, num_layers):
    """Fused forward kernel.

    refs = (x_ref, w_ref_0, ..., w_ref_{L-1}, beta_ref, out_ref)
      x_ref:    (TB, d*C_in)            flattened input tile (pos-outer, channel-inner)
      w_ref_l:  (l_in_l*C_in_l, l_out_l*h)  block-diagonal LCN weights, scale folded in
      beta_ref: (l_final*h, N_pad)      readout (spatial mean and 1/h folded in, 0-padded)
      out_ref:  (TB, N_pad)
    """
    x_ref = refs[0]
    w_refs = refs[1:1 + num_layers]
    beta_ref = refs[1 + num_layers]
    out_ref = refs[2 + num_layers]

    y = x_ref[...]                                        # (TB, d*C_in), bf16
    for w_ref in w_refs:
        z = jnp.dot(y, w_ref[...], preferred_element_type=jnp.float32)
        z = jnp.maximum(z, 0.0)                           # ReLU after every LCN layer
        y = z.astype(w_ref.dtype)                         # back to bf16 for the next MXU pass
    # TODO(synk): bias=True variant (x += bias*0.1) not implemented; module default is bias=False.

    out = jnp.dot(y, beta_ref[...], preferred_element_type=jnp.float32)
    out_ref[...] = out.astype(out_ref.dtype)


def _pack_block_diag(w, dtype):
    """Torch-layout LCN weight (C_out, C_in, L_in) -> block-diagonal (L_in*C_in, L_out*C_out).

    Row index = pos*C_in + c (input layout), col index = p*C_out + o (output layout),
    entry = w[o, c, pos] if pos in {2p, 2p+1} else 0, with 1/sqrt(C_in) folded in.
    """
    c_out, c_in, l_in = w.shape
    assert l_in % 2 == 0, "LCN layer needs an even spatial length"
    l_out = l_in // 2
    # w_r[p, k, c, o] = w[o, c, 2p + k]
    w_r = jnp.transpose(w.reshape(c_out, c_in, l_out, 2), (2, 3, 1, 0))
    blocks = w_r.reshape(l_out, 2 * c_in, c_out) / math.sqrt(float(c_in))
    big = jnp.zeros((l_in * c_in, l_out * c_out), jnp.float32)
    for p in range(l_out):
        big = big.at[p * 2 * c_in:(p + 1) * 2 * c_in,
                     p * c_out:(p + 1) * c_out].set(blocks[p])
    return big.astype(dtype)


def locally_hierarchical_net(x_ncl, weights, beta, *, block_b=None,
                             compute_dtype=jnp.bfloat16):
    """x_ncl: (B, C_in, d) PyTorch NCL layout. weights: list of torch-layout
    (h, C_in_l, L_in_l) arrays. beta: (h, out_dim)."""
    B, C_in, d = x_ncl.shape
    num_layers = len(weights)
    h, out_dim = beta.shape

    # Flatten input to lanes: v[b, pos*C_in + c] = x[b, c, pos].
    x = jnp.transpose(x_ncl, (0, 2, 1)).reshape(B, d * C_in).astype(compute_dtype)

    # Block-diagonal per-layer weights with 1/sqrt(C_in_l) folded in.
    w_bd = []
    cur_len, cur_cin = d, C_in
    for w in weights:
        c_out, c_in_l, l_in = w.shape
        assert c_in_l == cur_cin and l_in == cur_len and l_in % 2 == 0
        w_bd.append(_pack_block_diag(w, compute_dtype))
        cur_len, cur_cin = l_in // 2, c_out
    l_final = cur_len                                    # spatial length after the hierarchy (=1)

    # Readout: spatial mean + (@ beta / h) folded into one tiled, lane-padded matrix.
    n_pad = max(128, pl.cdiv(out_dim, 128) * 128)
    beta_big = jnp.tile(beta, (l_final, 1)) / float(h * l_final)     # (l_final*h, out_dim)
    beta_big = jnp.pad(beta_big, ((0, 0), (0, n_pad - out_dim))).astype(compute_dtype)

    TB = block_b or B
    assert B % TB == 0 and TB % 8 == 0
    grid = (B // TB,)

    in_specs = [pl.BlockSpec((TB, d * C_in), lambda i: (i, 0))]
    for wb in w_bd:
        in_specs.append(pl.BlockSpec(wb.shape, lambda i: (0, 0)))
    in_specs.append(pl.BlockSpec(beta_big.shape, lambda i: (0, 0)))
    out_specs = pl.BlockSpec((TB, n_pad), lambda i: (i, 0))

    # VMEM budget: double-buffered x / out tiles + (conservatively) double-buffered weights.
    isz = jnp.dtype(compute_dtype).itemsize
    needed = (2 * TB * d * C_in * isz
              + 2 * TB * n_pad * 4
              + 2 * sum(int(wb.size) for wb in w_bd) * isz
              + 2 * int(beta_big.size) * isz)
    vmem_limit = int(min(max(4 * needed, 8 * 1024 * 1024), 64 * 1024 * 1024))

    kernel = functools.partial(lhn_kernel, num_layers=num_layers)
    out = pl.pallas_call(
        kernel,
        out_shape=jax.ShapeDtypeStruct((B, n_pad), jnp.float32),
        grid_spec=pltpu.PrefetchScalarGridSpec(
            num_scalar_prefetch=0,
            grid=grid,
            in_specs=in_specs,
            out_specs=out_specs,
        ),
        compiler_params=pltpu.CompilerParams(
            dimension_semantics=("parallel",),
            vmem_limit_bytes=vmem_limit),
    )(x, *w_bd, beta_big)
    return out[:, :out_dim]


def init_params(key, input_channels, h, out_dim, num_layers, s=2):
    """Deterministic synthetic params matching torch.randn shapes in __init__."""
    d = s ** num_layers
    keys = jax.random.split(key, num_layers + 1)
    weights = []
    c_in = input_channels
    for l in range(num_layers):
        out_dim_l = d // (2 ** (l + 1))
        w = jax.random.normal(keys[l], (h, c_in, out_dim_l * s), jnp.float32)
        weights.append(w)
        c_in = h
    beta = jax.random.normal(keys[-1], (h, out_dim), jnp.float32)
    return weights, beta


def reference_forward(x_ncl, weights, beta):
    """Pure-JAX transcription of the PyTorch forward (f32, for validation)."""
    y = x_ncl
    for w in weights:
        c_out, c_in, l_in = w.shape
        z = y[:, None, :, :] * w[None]                    # (B, C_out, C_in, L)
        z = z.reshape(*z.shape[:-1], l_in // 2, 2)
        z = z.sum(axis=(-1, -3)) / (c_in ** 0.5)          # (B, C_out, L//2)
        y = jax.nn.relu(z)
    y = y.mean(axis=-1)                                   # (B, h)
    return y @ beta / beta.shape[0]


if __name__ == "__main__":
    input_channels = 4
    h = 32
    out_dim = 10
    num_layers = 3
    s = 2
    d = s ** num_layers      # 8
    B = 256                  # 2 grid steps of TB=128 (keeps both v7x TCs busy)

    key = jax.random.PRNGKey(0)
    k_x, k_p = jax.random.split(key)
    x = jax.random.normal(k_x, (B, input_channels, d), jnp.float32)
    weights, beta = init_params(k_p, input_channels, h, out_dim, num_layers, s)

    out = locally_hierarchical_net(x, weights, beta, block_b=128)
    out = jax.block_until_ready(out)

    ref = jax.block_until_ready(reference_forward(x, weights, beta))
    assert out.shape == (B, out_dim)
    max_err = float(jnp.max(jnp.abs(out - ref)))
    # bf16 operands (f32 accumulation) -> loosened tolerance vs. the f32 reference.
    assert jnp.allclose(out, ref, rtol=5e-2, atol=5e-2), f"max abs err {max_err}"
    print("KERNEL_OK")
</pallas_src>

<mosaic_0001>
module attributes {stable_mosaic.version = 11 : i64} {
  func.func @lhn_kernel(%arg0: i32, %arg1: memref<128x32xbf16, #tpu.memory_space<vmem>>, %arg2: memref<32x128xbf16, #tpu.memory_space<vmem>>, %arg3: memref<128x64xbf16, #tpu.memory_space<vmem>>, %arg4: memref<64x32xbf16, #tpu.memory_space<vmem>>, %arg5: memref<32x128xbf16, #tpu.memory_space<vmem>>, %arg6: memref<128x128xf32, #tpu.memory_space<vmem>>) attributes {dimension_semantics = [#tpu.dimension_semantics<parallel>], iteration_bounds = array<i64: 2>, scalar_prefetch = 0 : i64, scratch_operands = 0 : i64, tpu.core_type = #tpu.core_type<tc>, window_params = [{transform_indices = @transform_0, window_bounds = array<i64: 128, 32>}, {pipeline_mode = #tpu.pipeline_mode<synchronous>, transform_indices = @transform_1, window_bounds = array<i64: 32, 128>}, {pipeline_mode = #tpu.pipeline_mode<synchronous>, transform_indices = @transform_2, window_bounds = array<i64: 128, 64>}, {pipeline_mode = #tpu.pipeline_mode<synchronous>, transform_indices = @transform_3, window_bounds = array<i64: 64, 32>}, {pipeline_mode = #tpu.pipeline_mode<synchronous>, transform_indices = @transform_4, window_bounds = array<i64: 32, 128>}, {transform_indices = @transform_5, window_bounds = array<i64: 128, 128>}]} {
    %c0 = arith.constant 0 : index
    %c0_0 = arith.constant 0 : index
    %0 = vector.load %arg1[%c0, %c0_0] : memref<128x32xbf16, #tpu.memory_space<vmem>>, vector<128x32xbf16>
    %c0_1 = arith.constant 0 : index
    %c0_2 = arith.constant 0 : index
    %1 = vector.load %arg2[%c0_1, %c0_2] : memref<32x128xbf16, #tpu.memory_space<vmem>>, vector<32x128xbf16>
    %cst = arith.constant dense<0.000000e+00> : vector<128x128xf32>
    %2 = tpu.matmul %0, %1, %cst {dimension_numbers = #tpu.dot_dimension_numbers<[1], [0], [0], [1], [0, 0, 1, 1], [], []>} : vector<128x32xbf16>, vector<32x128xbf16>, vector<128x128xf32> -> vector<128x128xf32>
    %cst_3 = arith.constant 0.000000e+00 : f32
    %3 = vector.broadcast %cst_3 : f32 to vector<128x128xf32>
    %4 = arith.maximumf %2, %3 : vector<128x128xf32>
    %5 = arith.truncf %4 : vector<128x128xf32> to vector<128x128xbf16>
    %c0_4 = arith.constant 0 : index
    %c0_5 = arith.constant 0 : index
    %6 = vector.load %arg3[%c0_4, %c0_5] : memref<128x64xbf16, #tpu.memory_space<vmem>>, vector<128x64xbf16>
    %cst_6 = arith.constant dense<0.000000e+00> : vector<128x64xf32>
    %7 = tpu.matmul %5, %6, %cst_6 {dimension_numbers = #tpu.dot_dimension_numbers<[1], [0], [0], [1], [0, 0, 1, 1], [], []>} : vector<128x128xbf16>, vector<128x64xbf16>, vector<128x64xf32> -> vector<128x64xf32>
    %cst_7 = arith.constant 0.000000e+00 : f32
    %8 = vector.broadcast %cst_7 : f32 to vector<128x64xf32>
    %9 = arith.maximumf %7, %8 : vector<128x64xf32>
    %10 = arith.truncf %9 : vector<128x64xf32> to vector<128x64xbf16>
    %c0_8 = arith.constant 0 : index
    %c0_9 = arith.constant 0 : index
    %11 = vector.load %arg4[%c0_8, %c0_9] : memref<64x32xbf16, #tpu.memory_space<vmem>>, vector<64x32xbf16>
    %cst_10 = arith.constant dense<0.000000e+00> : vector<128x32xf32>
    %12 = tpu.matmul %10, %11, %cst_10 {dimension_numbers = #tpu.dot_dimension_numbers<[1], [0], [0], [1], [0, 0, 1, 1], [], []>} : vector<128x64xbf16>, vector<64x32xbf16>, vector<128x32xf32> -> vector<128x32xf32>
    %cst_11 = arith.constant 0.000000e+00 : f32
    %13 = vector.broadcast %cst_11 : f32 to vector<128x32xf32>
    %14 = arith.maximumf %12, %13 : vector<128x32xf32>
    %15 = arith.truncf %14 : vector<128x32xf32> to vector<128x32xbf16>
    %c0_12 = arith.constant 0 : index
    %c0_13 = arith.constant 0 : index
    %16 = vector.load %arg5[%c0_12, %c0_13] : memref<32x128xbf16, #tpu.memory_space<vmem>>, vector<32x128xbf16>
    %cst_14 = arith.constant dense<0.000000e+00> : vector<128x128xf32>
    %17 = tpu.matmul %15, %16, %cst_14 {dimension_numbers = #tpu.dot_dimension_numbers<[1], [0], [0], [1], [0, 0, 1, 1], [], []>} : vector<128x32xbf16>, vector<32x128xbf16>, vector<128x128xf32> -> vector<128x128xf32>
    %c0_15 = arith.constant 0 : index
    %c0_16 = arith.constant 0 : index
    %18 = vector.load %arg6[%c0_15, %c0_16] : memref<128x128xf32, #tpu.memory_space<vmem>>, vector<128x128xf32>
    tpu.vector_store %arg6[%c0_15, %c0_16], %17 {strides = array<i32>} : memref<128x128xf32, #tpu.memory_space<vmem>>, vector<128x128xf32>,
    return
  }
  func.func @transform_0(%arg0: i32) -> (i32, i32) {
    %c0_i32 = arith.constant 0 : i32
    %c0_i32_0 = arith.constant 0 : i32
    return %arg0, %c0_i32 : i32, i32
  }
  func.func @transform_1(%arg0: i32) -> (i32, i32) {
    %c0_i32 = arith.constant 0 : i32
    %c0_i32_0 = arith.constant 0 : i32
    %c0_i32_1 = arith.constant 0 : i32
    return %c0_i32, %c0_i32_0 : i32, i32
  }
  func.func @transform_2(%arg0: i32) -> (i32, i32) {
    %c0_i32 = arith.constant 0 : i32
    %c0_i32_0 = arith.constant 0 : i32
    %c0_i32_1 = arith.constant 0 : i32
    return %c0_i32, %c0_i32_0 : i32, i32
  }
  func.func @transform_3(%arg0: i32) -> (i32, i32) {
    %c0_i32 = arith.constant 0 : i32
    %c0_i32_0 = arith.constant 0 : i32
    %c0_i32_1 = arith.constant 0 : i32
    return %c0_i32, %c0_i32_0 : i32, i32
  }
  func.func @transform_4(%arg0: i32) -> (i32, i32) {
    %c0_i32 = arith.constant 0 : i32
    %c0_i32_0 = arith.constant 0 : i32
    %c0_i32_1 = arith.constant 0 : i32
    return %c0_i32, %c0_i32_0 : i32, i32
  }
  func.func @transform_5(%arg0: i32) -> (i32, i32) {
    %c0_i32 = arith.constant 0 : i32
    %c0_i32_0 = arith.constant 0 : i32
    return %arg0, %c0_i32 : i32, i32
  }
}

</mosaic_0001>

<bundles_post_ra>
// kernel: tpu_custom_call.1
= control target key start
LH: loop header
LB: loop body
LE: loop exit
PB: predicated region body
PF: predicated region fallthrough
CT: control target
= control target key end

     0   :  { %10 = vsyncpa [#allocation3], 0  ;;  %s1615_s0 = inlined_call_operand.vmem [shape: bf16[256,32], index: 0, kind: input, shape index: {}]   ;;  %s1616_s1 = inlined_call_operand.vmem [shape: bf16[32,128], index: 1, kind: input, shape index: {}]   ;;  %s1617_s2 = inlined_call_operand.vmem [shape: bf16[128,64], index: 2, kind: input, shape index: {}]   ;;  %s1618_s3 = inlined_call_operand.vmem [shape: bf16[64,32], index: 3, kind: input, shape index: {}]   ;;  %s1619_s4 = inlined_call_operand.vmem [shape: bf16[32,128], index: 4, kind: input, shape index: {}]   ;;  %s1620_s5 = inlined_call_operand.hbm [shape: f32[256,128], index: 5, kind: output, shape index: {}]  }
   0x1   :  { %12 = vsyncpa [#allocation3 + $0x1], 0  ;;  %s1408_s18 = smov 0   ;;  %s1410_s19 = smov 0  }
   0x2   :  { %s1412_s20 = smov 0   ;;  %s1414_s21 = smov 0  }
   0x3 LB: > { %s1429_s22 = sadd.s32 4294967295, %s1373_s21   ;;  %s1037_s23 = sadd.s32 4294967294, %s1373_s21   ;;  %s1373_s21 = sphi %s1414_s21, %s1626_s21   ;;  %s1369_s20 = sphi %s1412_s20, %s1625_s20   ;;  %s1365_s19 = sphi %s1410_s19, %s1624_s19   ;;  %s1361_s18 = sphi %s1408_s18, %s1623_s18  }
   0x4   : > { %s1433_s24 = sadd.s32 1, %s1373_s21   ;;  %s135_s25 = sadd.s32 1, %s1369_s20 }
   0x5   : > { %s132_s26 = ssub.s32 %s1373_s21, %s1433_s24  ;;  %p145_p0 = scmp.ne.s32.totalorder %s1369_s20, %s1365_s19 }
   0x6   : > { %p133_p1 = scmp.eq.s32.totalorder %s132_s26, 0  ;;  %p146_p2 = scmp.eq.s32.totalorder %s1429_s22, 1 }
   0x7   : > { %p151_p3 = scmp.ne.s32.totalorder %s1365_s19, %s1361_s18  ;;  %p152_p4 = scmp.eq.s32.totalorder %s1037_s23, 1 }
   0x8   : > { %s1444_s27 = scalar_select %p133_p1, %s1369_s20, %s135_s25  }
   0x9   : > { %p1446_p5 = por %p146_p2, %p145_p0  ;;  %p1450_p6 = por %p152_p4, %p151_p3 }
   0xa   : > { %p1040_p7 = scmp.ge.s32.totalorder %s1373_s21, 1  ;;  %p191_p8 = scmp.lt.s32.totalorder %s1373_s21, 3 }
   0xc   : > { %p192_p9 = pnand %p1040_p7, %p191_p8 }
   0xd   : > { %v1287_v0 = vld [vmem:[%s1616_s1] sm:$0xff] (!%p192_p9)   ;;  %s1042_s7 = sshll.u32 (!%p192_p9), %s1429_s22, 4  ;;  %v1288_v1 = vld [vmem:[%s1616_s1 + $0x8] sm:$0xff] (!%p192_p9)   ;;  %vm299_vm0 = vcmask (!%p192_p9), 261120   ;;  %v1299_v4 = vld [vmem:[%s1617_s2 + $0x10] sm:$0xff] (!%p192_p9)   ;;  %vm662_vm1 = vcmask (!%p192_p9), 523264  }
   0xe   : > { %195 = sbr.rel (%p192_p9) target bundleno = 940 (0x3ac), region = 40  ;;  %p220_p10 = scmp.lt.s32.totalorder (!%p192_p9), %s1042_s7, 31  ;;  %1146 = vmatprep.subr.bf16.mxu0 (!%p192_p9), %v1287_v0  ;;  %v1297_v2 = vld [vmem:[%s1617_s2] sm:$0xff] (!%p192_p9)   ;;  %v1298_v3 = vld [vmem:[%s1617_s2 + $0x8] sm:$0xff] (!%p192_p9)   ;;  %v1300_v8 = vld [vmem:[%s1617_s2 + $0x18] sm:$0xff] (!%p192_p9)  }
   0xf   : > { %1147 = vmatpush3.bf16.msra.mxu0 (!%p192_p9), %v1287_v0  ;;  %1166 = vmatprep.subr.bf16.mxu1 (!%p192_p9), %v1297_v2  ;;  %v1301_v9 = vld [vmem:[%s1617_s2 + $0x20] sm:$0xff] (!%p192_p9)   ;;  %v1302_v12 = vld [vmem:[%s1617_s2 + $0x28] sm:$0xff] (!%p192_p9)   ;;  %v1303_v16 = vld [vmem:[%s1617_s2 + $0x30] sm:$0xff] (!%p192_p9)   ;;  %s216_s10 = sand.u32 (!%p192_p9), 1, %s1365_s19   ;;  %s1097_s13 = sshll.u32 (!%p192_p9), %s1429_s22, 11 }
  0x10   : > { %1148 = vmatprep.subr.bf16.mxu0 (!%p192_p9), %v1288_v1  ;;  %1167 = vmatpush3.bf16.msra.mxu1 (!%p192_p9), %v1297_v2  ;;  %v1304_v17 = vld [vmem:[%s1617_s2 + $0x38] sm:$0xff] (!%p192_p9)   ;;  %v1305_v18 = vld [vmem:[%s1618_s3] sm:$0xff] (!%p192_p9)   ;;  %v1306_v19 = vld [vmem:[%s1618_s3 + $0x8] sm:$0xff] (!%p192_p9)   ;;  %s1041_s11 = sshll.u32 (!%p192_p9), %s216_s10, 7  ;;  %s1574_s22 = scalar_lea.sflag (!%p192_p9), [#allocation3], %s216_s10 }
  0x11   : > { %1168 = vmatprep.subr.bf16.mxu1 (!%p192_p9), %v1298_v3  ;;  %v1307_v20 = vld [vmem:[%s1618_s3 + $0x10] sm:$0xff] (!%p192_p9)   ;;  %v1308_v61 = vld [vmem:[%s1618_s3 + $0x18] sm:$0xff] (!%p192_p9)   ;;  %v1309_v62 = vld [vmem:[%s1619_s4] sm:$0xff] (!%p192_p9)   ;;  %s1545_s12 = scalar_lea.vmem (!%p192_p9), [#allocation2], %s1041_s11  ;;  %s1375_s25 = smov (!%p192_p9), [#allocation2]  }
  0x12   : > { %s1315_s26 = sshll.u32 (!%p192_p9), %s1375_s25, 4  ;;  %s1316_s26 = int_to_ptr.vmem [resolvable:$false] %s1315_s26 }
  0x13   : > { %1149 = vmatpush3.bf16.msra.mxu0 (!%p192_p9), %v1288_v1  ;;  %s1317_s30 = scalar_lea.vmem (!%p192_p9), %s1316_s26, 4096 }
  0x14   : > { %1169 = vmatpush3.bf16.msra.mxu1 (!%p192_p9), %v1298_v3  ;;  %1198 = vmatprep.subr.bf16.mxu0 (!%p192_p9), %v1305_v18 }
  0x15   : > { %s1628_s7 = smov (!%p220_p10, %s1042_s7), 31  ;;  %1170 = vmatprep.subr.bf16.mxu1 %v1299_v4 }
  0x16   : > { %s1043_s14 = sshll.u32 %s1628_s7, 2 }
  0x17   : > { %s1472_s17 = scalar_lea.vmem %s1615_s0, %s1043_s14  ;;  %s975_s14 = sshll.u32 %s1545_s12, 4  ;;  %s1567_s14 = int_to_ptr.vmem [resolvable:$true] %s975_s14 }
  0x18   : > { %v1289_v5 = vld [vmem:[%s1472_s17] sm:$0xff]   ;;  %v1290_v6 = vld [vmem:[%s1472_s17 + $0x8] sm:$0xff]   ;;  %v1291_v7 = vld [vmem:[%s1472_s17 + $0x10] sm:$0xff]   ;;  %1171 = vmatpush3.bf16.msra.mxu1 %v1299_v4  ;;  %s1311_s23 = scalar_lea.vmem %s1567_s14, 2048  ;;  %p1318_p0 = scmp.lt.s32.totalorder %s1567_s14, %s1316_s26 }
  0x19   : > { %1150 = vmatprep.mubr.msk.bf16.mxu0 %vm299_vm0, %v1289_v5  ;;  %v1292_v10 = vld [vmem:[%s1472_s17 + $0x18] sm:$0xff]   ;;  %1172 = vmatprep.subr.bf16.mxu1 %v1300_v8  ;;  %v1293_v11 = vld [vmem:[%s1472_s17 + $0x20] sm:$0xff]   ;;  %v1294_v13 = vld [vmem:[%s1472_s17 + $0x28] sm:$0xff]   ;;  %p1312_p11 = scmp.ne.s32.totalorder %s1567_s14, %s1311_s23  ;;  %p1319_p1 = scmp.lt.s32.totalorder %s1317_s30, %s1311_s23 }
  0x1a   : > { %1151 = vmatmul.mubr.msk.bf16.vlgmr.msra.gmra.mrb[0].mxu0 %vm299_vm0, %v1290_v6  ;;  %v1295_v14 = vld [vmem:[%s1472_s17 + $0x30] sm:$0xff]   ;;  %v1296_v15 = vld [vmem:[%s1472_s17 + $0x38] sm:$0xff]   ;;  %s1565_s17 = scalar_lea.hbm %s1620_s5, %s1097_s13 }
  0x1b   : > { %1154 = vmatprep.mubr.msk.bf16.mxu0 %vm299_vm0, %v1291_v7  ;;  %1199 = vmatpush3.bf16.msra.mxu0 %v1305_v18  ;;  %p1313_p12 = pnand %p1312_p11, %p1446_p5  ;;  %p1320_p2 = por %p1319_p1, %p1318_p0 }
  0x1c   : > { %1173 = vmatpush3.bf16.msra.mxu1 %v1300_v8  ;;  %1200 = vmatprep.subr.bf16.mxu0 %v1306_v19 }
  0x1d   : > { %1174 = vmatprep.subr.bf16.mxu1 %v1301_v9  ;;  %p1314_p13 = pneg %p1313_p12 }
  0x1f   : > { %1201 = vmatpush3.bf16.msra.mxu0 %v1306_v19  ;;  %p1321_p3 = pnand %p1320_p2, %p1314_p13 }
  0x20   : > { %1175 = vmatpush3.bf16.msra.mxu1 %v1301_v9  ;;  %1202 = vmatprep.subr.bf16.mxu0 %v1307_v20 }
  0x21   : > { %1176 = vmatprep.subr.bf16.mxu1 %v1302_v12 }
  0x22   : > { %1155 = vmatmul.mubr.msk.bf16.gmra.mrb[4].mxu0 %vm299_vm0, %v1292_v10 }
  0x23   : > { %1158 = vmatprep.mubr.msk.bf16.mxu0 %vm299_vm0, %v1293_v11  ;;  %1203 = vmatpush3.bf16.msra.mxu0 %v1307_v20 }
  0x24   : > { %1177 = vmatpush3.bf16.msra.mxu1 %v1302_v12  ;;  %1204 = vmatprep.subr.bf16.mxu0 %v1308_v61 }
  0x25   : > { %1178 = vmatprep.subr.bf16.mxu1 %v1303_v16 }
  0x27   : > { %1205 = vmatpush3.bf16.msra.mxu0 %v1308_v61 }
  0x28   : > { %1179 = vmatpush3.bf16.msra.mxu1 %v1303_v16  ;;  %1222 = vmatprep.subr.bf16.mxu0 %v1309_v62 }
  0x29   : > { %1180 = vmatprep.subr.bf16.mxu1 %v1304_v17 }
  0x2a   : > { %1159 = vmatmul.mubr.msk.bf16.gmra.mrb[8].mxu0 %vm299_vm0, %v1294_v13 }
  0x2b   : > { %1162 = vmatprep.mubr.msk.bf16.mxu0 %vm299_vm0, %v1295_v14 }
  0x2c   : > { %1181 = vmatpush3.bf16.msra.mxu1 %v1304_v17 }
  0x2d   : > { %1242 = vmatprep.subr.bf16.mxu1 %v1309_v62 }
  0x32   : > { %1163 = vmatmul.mubr.msk.bf16.gmra.mrb[12].mxu0 %vm299_vm0, %v1296_v15 }
  0xed   : > { %v1152_v21 = vpop.f32.mrb[0].mxu0 }
  0xee   : > { %v358_v22 = vpop.f32.mrb[1].mxu0  ;;  %v423_v24 = vmax.f32 %v1152_v21, 0.0 }
  0xef   : > { %v1153_v23 = vpop.f32.mrb[2].mxu0  ;;  %v421_v27 = vmax.f32 %v358_v22, 0.0 }
  0xf0   : > { %v424_v25 = vmax.f32 %v1153_v23, 0.0  ;;  %v361_v26 = vpop.f32.mrb[3].mxu0 }
  0xf1   : > { %v422_v28 = vmax.f32 %v361_v26, 0.0 }
  0xf2   : > { %v438_v29 = vpack.c.bf16 %v424_v25, %v423_v24 }
  0xf3   : > { %v437_v30 = vpack.c.bf16 %v422_v28, %v421_v27 }
  0xf5   : > { %v1156_v31 = vpop.f32.mrb[4].mxu0  ;;  %1182 = vmatprep.mubr.bf16.mxu1 %v437_v30 }
  0xf6   : > { %v374_v32 = vpop.f32.mrb[5].mxu0  ;;  %1183 = vmatmul.mubr.bf16.vlgmr.msra.gmra.mrb[0].mxu1 %v438_v29  ;;  %v427_v34 = vmax.f32 %v1156_v31, 0.0 }
  0xf7   : > { %v1157_v33 = vpop.f32.mrb[6].mxu0  ;;  %v425_v37 = vmax.f32 %v374_v32, 0.0  ;;  %1244 = vmatpush3.bf16.msra.mxu1 %v1309_v62 }
  0xf8   : > { %v428_v35 = vmax.f32 %v1157_v33, 0.0  ;;  %v377_v36 = vpop.f32.mrb[7].mxu0 }
  0xf9   : > { %v426_v38 = vmax.f32 %v377_v36, 0.0 }
  0xfa   : > { %v440_v39 = vpack.c.bf16 %v428_v35, %v427_v34 }
  0xfb   : > { %v439_v40 = vpack.c.bf16 %v426_v38, %v425_v37 }
  0xfd   : > { %v1160_v41 = vpop.f32.mrb[8].mxu0  ;;  %1186 = vmatprep.mubr.bf16.mxu1 %v439_v40 }
  0xfe   : > { %v390_v42 = vpop.f32.mrb[9].mxu0  ;;  %1187 = vmatmul.mubr.bf16.gmra.mrb[4].mxu1 %v440_v39  ;;  %v431_v44 = vmax.f32 %v1160_v41, 0.0  ;;  %v1310_v39 = vld [vmem:[%s1619_s4 + $0x8] sm:$0xff]  }
  0xff   : > { %v1161_v43 = vpop.f32.mrb[10].mxu0  ;;  %v429_v47 = vmax.f32 %v390_v42, 0.0  ;;  %1243 = vmatprep.subr.bf16.mxu1 %v1310_v39 }
 0x100   : > { %v432_v45 = vmax.f32 %v1161_v43, 0.0  ;;  %v393_v46 = vpop.f32.mrb[11].mxu0  ;;  %1245 = vmatpush3.bf16.msra.mxu1 %v1310_v39 }
 0x101   : > { %v430_v48 = vmax.f32 %v393_v46, 0.0 }
 0x102   : > { %v442_v49 = vpack.c.bf16 %v432_v45, %v431_v44 }
 0x103   : > { %v441_v50 = vpack.c.bf16 %v430_v48, %v429_v47 }
 0x105   : > { %v1164_v51 = vpop.f32.mrb[12].mxu0  ;;  %1190 = vmatprep.mubr.bf16.mxu1 %v441_v50 }
 0x106   : > { %v406_v52 = vpop.f32.mrb[13].mxu0  ;;  %1191 = vmatmul.mubr.bf16.gmra.mrb[8].mxu1 %v442_v49  ;;  %v435_v54 = vmax.f32 %v1164_v51, 0.0 }
 0x107   : > { %v1165_v53 = vpop.f32.mrb[14].mxu0  ;;  %v433_v57 = vmax.f32 %v406_v52, 0.0 }
 0x108   : > { %v436_v55 = vmax.f32 %v1165_v53, 0.0  ;;  %v409_v56 = vpop.f32.mrb[15].mxu0 }
 0x109   : > { %v434_v58 = vmax.f32 %v409_v56, 0.0 }
 0x10a   : > { %v444_v59 = vpack.c.bf16 %v436_v55, %v435_v54 }
 0x10b   : > { %v443_v60 = vpack.c.bf16 %v434_v58, %v433_v57 }
 0x10d   : > { %1194 = vmatprep.mubr.bf16.mxu1 %v443_v60 }
 0x10e   : > { %1195 = vmatmul.mubr.bf16.gmra.mrb[12].mxu1 %v444_v59 }
 0x1c9   : > { %v1184_v63 = vpop.f32.mrb[0].mxu1 }
 0x1ca   : > { %v543_v0 = vpop.f32.mrb[1].mxu1  ;;  %v608_v2 = vmax.f32 %v1184_v63, 0.0 }
 0x1cb   : > { %v1185_v1 = vpop.f32.mrb[2].mxu1  ;;  %v606_v5 = vmax.f32 %v543_v0, 0.0 }
 0x1cc   : > { %v609_v3 = vmax.f32 %v1185_v1, 0.0  ;;  %v546_v4 = vpop.f32.mrb[3].mxu1 }
 0x1cd   : > { %v607_v6 = vmax.f32 %v546_v4, 0.0 }
 0x1ce   : > { %v623_v7 = vpack.c.bf16 %v609_v3, %v608_v2 }
 0x1cf   : > { %v622_v8 = vpack.c.bf16 %v607_v6, %v606_v5 }
 0x1d1   : > { %v1188_v9 = vpop.f32.mrb[4].mxu1  ;;  %1206 = vmatprep.mubr.msk.bf16.mxu0 %vm662_vm1, %v622_v8 }
 0x1d2   : > { %v559_v10 = vpop.f32.mrb[5].mxu1  ;;  %1207 = vmatmul.mubr.msk.bf16.vlgmr.msra.gmra.mrb[16].mxu0 %vm662_vm1, %v623_v7  ;;  %v612_v12 = vmax.f32 %v1188_v9, 0.0 }
 0x1d3   : > { %v1189_v11 = vpop.f32.mrb[6].mxu1  ;;  %1223 = vmatpush3.bf16.msra.mxu0 %v1309_v62  ;;  %v610_v15 = vmax.f32 %v559_v10, 0.0 }
 0x1d4   : > { %v613_v13 = vmax.f32 %v1189_v11, 0.0  ;;  %v562_v14 = vpop.f32.mrb[7].mxu1  ;;  %1224 = vmatprep.subr.bf16.mxu0 %v1310_v39 }
 0x1d5   : > { %v611_v16 = vmax.f32 %v562_v14, 0.0 }
 0x1d6   : > { %v625_v17 = vpack.c.bf16 %v613_v13, %v612_v12 }
 0x1d7   : > { %v624_v18 = vpack.c.bf16 %v611_v16, %v610_v15  ;;  %1225 = vmatpush3.bf16.msra.mxu0 %v1310_v39 }
 0x1d9   : > { %v1192_v19 = vpop.f32.mrb[8].mxu1  ;;  %1210 = vmatprep.mubr.msk.bf16.mxu0 %vm662_vm1, %v624_v18 }
 0x1da   : > { %v575_v20 = vpop.f32.mrb[9].mxu1  ;;  %1211 = vmatmul.mubr.msk.bf16.gmra.mrb[20].mxu0 %vm662_vm1, %v625_v17  ;;  %v616_v22 = vmax.f32 %v1192_v19, 0.0 }
 0x1db   : > { %v1193_v21 = vpop.f32.mrb[10].mxu1  ;;  %v614_v25 = vmax.f32 %v575_v20, 0.0 }
 0x1dc   : > { %v617_v23 = vmax.f32 %v1193_v21, 0.0  ;;  %v578_v24 = vpop.f32.mrb[11].mxu1 }
 0x1dd   : > { %v615_v26 = vmax.f32 %v578_v24, 0.0 }
 0x1de   : > { %v627_v27 = vpack.c.bf16 %v617_v23, %v616_v22 }
 0x1df   : > { %v626_v28 = vpack.c.bf16 %v615_v26, %v614_v25 }
 0x1e1   : > { %v1196_v29 = vpop.f32.mrb[12].mxu1  ;;  %1214 = vmatprep.mubr.msk.bf16.mxu0 %vm662_vm1, %v626_v28 }
 0x1e2   : > { %v591_v30 = vpop.f32.mrb[13].mxu1  ;;  %1215 = vmatmul.mubr.msk.bf16.gmra.mrb[24].mxu0 %vm662_vm1, %v627_v27  ;;  %v620_v32 = vmax.f32 %v1196_v29, 0.0 }
 0x1e3   : > { %v1197_v31 = vpop.f32.mrb[14].mxu1  ;;  %v618_v35 = vmax.f32 %v591_v30, 0.0 }
 0x1e4   : > { %v621_v33 = vmax.f32 %v1197_v31, 0.0  ;;  %v594_v34 = vpop.f32.mrb[15].mxu1 }
 0x1e5   : > { %v619_v36 = vmax.f32 %v594_v34, 0.0 }
 0x1e6   : > { %v629_v37 = vpack.c.bf16 %v621_v33, %v620_v32 }
 0x1e7   : > { %v628_v38 = vpack.c.bf16 %v619_v36, %v618_v35 }
 0x1e9   : > { %1218 = vmatprep.mubr.msk.bf16.mxu0 %vm662_vm1, %v628_v38 }
 0x1ea   : > { %1219 = vmatmul.mubr.msk.bf16.gmra.mrb[28].mxu0 %vm662_vm1, %v629_v37 }
 0x2a5   : > { %v1208_v40 = vpop.f32.mrb[16].mxu0 }
 0x2a6   : > { %v721_v41 = vpop.f32.mrb[17].mxu0  ;;  %v786_v43 = vmax.f32 %v1208_v40, 0.0 }
 0x2a7   : > { %v1209_v42 = vpop.f32.mrb[18].mxu0  ;;  %v784_v46 = vmax.f32 %v721_v41, 0.0 }
 0x2a8   : > { %v787_v44 = vmax.f32 %v1209_v42, 0.0  ;;  %v724_v45 = vpop.f32.mrb[19].mxu0 }
 0x2a9   : > { %v785_v47 = vmax.f32 %v724_v45, 0.0 }
 0x2aa   : > { %v801_v48 = vpack.c.bf16 %v787_v44, %v786_v43 }
 0x2ab   : > { %v800_v49 = vpack.c.bf16 %v785_v47, %v784_v46 }
 0x2ad   : > { %v1212_v50 = vpop.f32.mrb[20].mxu0  ;;  %1226 = vmatprep.mubr.msk.bf16.mxu0 %vm299_vm0, %v800_v49 }
 0x2ae   : > { %v737_v51 = vpop.f32.mrb[21].mxu0  ;;  %1227 = vmatmul.mubr.msk.bf16.vlgmr.msra.gmra.mrb[32].mxu0 %vm299_vm0, %v801_v48  ;;  %v790_v53 = vmax.f32 %v1212_v50, 0.0 }
 0x2af   : > { %v1213_v52 = vpop.f32.mrb[22].mxu0  ;;  %v788_v56 = vmax.f32 %v737_v51, 0.0 }
 0x2b0   : > { %v791_v54 = vmax.f32 %v1213_v52, 0.0  ;;  %v740_v55 = vpop.f32.mrb[23].mxu0 }
 0x2b1   : > { %v789_v57 = vmax.f32 %v740_v55, 0.0 }
 0x2b2   : > { %v803_v58 = vpack.c.bf16 %v791_v54, %v790_v53 }
 0x2b3   : > { %v802_v59 = vpack.c.bf16 %v789_v57, %v788_v56 }
 0x2b5   : > { %v1216_v60 = vpop.f32.mrb[24].mxu0  ;;  %1230 = vmatprep.mubr.msk.bf16.mxu1 %vm299_vm0, %v802_v59 }
 0x2b6   : > { %v753_v61 = vpop.f32.mrb[25].mxu0  ;;  %1231 = vmatmul.mubr.msk.bf16.vlgmr.msra.gmra.mrb[16].mxu1 %vm299_vm0, %v803_v58  ;;  %v794_v63 = vmax.f32 %v1216_v60, 0.0 }
 0x2b7   : > { %v1217_v62 = vpop.f32.mrb[26].mxu0  ;;  %v792_v2 = vmax.f32 %v753_v61, 0.0 }
 0x2b8   : > { %v795_v0 = vmax.f32 %v1217_v62, 0.0  ;;  %v756_v1 = vpop.f32.mrb[27].mxu0 }
 0x2b9   : > { %v793_v3 = vmax.f32 %v756_v1, 0.0 }
 0x2ba   : > { %v805_v4 = vpack.c.bf16 %v795_v0, %v794_v63 }
 0x2bb   : > { %v804_v5 = vpack.c.bf16 %v793_v3, %v792_v2 }
 0x2bd   : > { %v1220_v6 = vpop.f32.mrb[28].mxu0  ;;  %1234 = vmatprep.mubr.msk.bf16.mxu1 %vm299_vm0, %v804_v5 }
 0x2be   : > { %v769_v7 = vpop.f32.mrb[29].mxu0  ;;  %1235 = vmatmul.mubr.msk.bf16.gmra.mrb[20].mxu1 %vm299_vm0, %v805_v4  ;;  %v798_v9 = vmax.f32 %v1220_v6, 0.0 }
 0x2bf   : > { %v1221_v8 = vpop.f32.mrb[30].mxu0  ;;  %v796_v12 = vmax.f32 %v769_v7, 0.0 }
 0x2c0   : > { %v799_v10 = vmax.f32 %v1221_v8, 0.0  ;;  %v772_v11 = vpop.f32.mrb[31].mxu0 }
 0x2c1   : > { %v797_v13 = vmax.f32 %v772_v11, 0.0 }
 0x2c2   : > { %v807_v14 = vpack.c.bf16 %v799_v10, %v798_v9 }
 0x2c3   : > { %v806_v15 = vpack.c.bf16 %v797_v13, %v796_v12 }
 0x2c5   : > { %1238 = vmatprep.mubr.msk.bf16.mxu1 %vm299_vm0, %v806_v15 }
 0x2c6   : > { %1239 = vmatmul.mubr.msk.bf16.gmra.mrb[24].mxu1 %vm299_vm0, %v807_v14 }
 0x381   : > { %v1228_v16 = vpop.f32.mrb[32].mxu0 }
 0x382   : > { %947 = vst [vmem:[%s1545_s12 + $0x10] sm:$0xff] %v1228_v16  ;;  %v882_v17 = vpop.f32.mrb[33].mxu0 }
 0x383   : > { %945 = vst [vmem:[%s1545_s12] sm:$0xff] %v882_v17  ;;  %v1229_v18 = vpop.f32.mrb[34].mxu0 }
 0x384   : > { %948 = vst [vmem:[%s1545_s12 + $0x18] sm:$0xff] %v1229_v18  ;;  %v885_v19 = vpop.f32.mrb[35].mxu0 }
 0x385   : > { %946 = vst [vmem:[%s1545_s12 + $0x8] sm:$0xff] %v885_v19 }
 0x389   : > { %v1232_v20 = vpop.f32.mrb[16].mxu1 }
 0x38a   : > { %951 = vst [vmem:[%s1545_s12 + $0x30] sm:$0xff] %v1232_v20  ;;  %v898_v21 = vpop.f32.mrb[17].mxu1 }
 0x38b   : > { %949 = vst [vmem:[%s1545_s12 + $0x20] sm:$0xff] %v898_v21  ;;  %v1233_v22 = vpop.f32.mrb[18].mxu1 }
 0x38c   : > { %952 = vst [vmem:[%s1545_s12 + $0x38] sm:$0xff] %v1233_v22  ;;  %v901_v23 = vpop.f32.mrb[19].mxu1 }
 0x38d   : > { %950 = vst [vmem:[%s1545_s12 + $0x28] sm:$0xff] %v901_v23 }
 0x391   : > { %v1236_v24 = vpop.f32.mrb[20].mxu1 }
 0x392   : > { %955 = vst [vmem:[%s1545_s12 + $0x50] sm:$0xff] %v1236_v24  ;;  %v914_v25 = vpop.f32.mrb[21].mxu1 }
 0x393   : > { %953 = vst [vmem:[%s1545_s12 + $0x40] sm:$0xff] %v914_v25  ;;  %v1237_v26 = vpop.f32.mrb[22].mxu1 }
 0x394   : > { %956 = vst [vmem:[%s1545_s12 + $0x58] sm:$0xff] %v1237_v26  ;;  %v917_v27 = vpop.f32.mrb[23].mxu1 }
 0x395   : > { %954 = vst [vmem:[%s1545_s12 + $0x48] sm:$0xff] %v917_v27 }
 0x399   : > { %v1240_v28 = vpop.f32.mrb[24].mxu1 }
 0x39a   : > { %959 = vst [vmem:[%s1545_s12 + $0x70] sm:$0xff] %v1240_v28  ;;  %v930_v29 = vpop.f32.mrb[25].mxu1 }
 0x39b   : > { %957 = vst [vmem:[%s1545_s12 + $0x60] sm:$0xff] %v930_v29  ;;  %v1241_v30 = vpop.f32.mrb[26].mxu1 }
 0x39c   : > { %960 = vst [vmem:[%s1545_s12 + $0x78] sm:$0xff] %v1241_v30  ;;  %v933_v31 = vpop.f32.mrb[27].mxu1 }
 0x39d   : > { %958 = vst [vmem:[%s1545_s12 + $0x68] sm:$0xff] %v933_v31 }
 0x39e   : > { %1324 = shalt.err (!%p1321_p3)
}
 0x39f   : > { %s1325_s6 = scalar_lea.hbm %s1565_s17, 2048  ;;  %s1329_s9 = scalar_lea.hbm %s1620_s5, 4096 }
 0x3a0   : > { %p1326_p4 = scmp.ne.s32.totalorder %s1565_s17, %s1325_s6  ;;  %p1330_p9 = scmp.lt.u32.totalorder %s1565_s17, %s1620_s5 }
 0x3a1   : > { %p1331_p10 = scmp.lt.u32.totalorder %s1329_s9, %s1325_s6  ;;  %p1333_p12 = scmp.lt.u32.totalorder %s1325_s6, %s1565_s17 }
 0x3a2   : > { %p1327_p7 = pnand %p1326_p4, %p1446_p5 }
 0x3a3   : > { %p1332_p11 = por %p1331_p10, %p1330_p9 }
 0x3a4   : > { %p1328_p8 = pneg %p1327_p7 }
 0x3a5   : > { %p1334_p13 = por %p1333_p12, %p1332_p11 }
 0x3a7   : > { %p1335_p0 = pnand %p1334_p13, %p1328_p8 }
 0x3a9   : > { %1338 = shalt.err (!%p1335_p0)
}
 0x3aa   : > { %s1376_s12 = smov 128   ;;  %s1377_s13 = smov 8  }
 0x3ab   : > { %1246 = dma.vmem_to_hbm [thread:$0]  (%p1446_p5), %s1567_s14, 2048, %s1565_s17, %s1574_s22, %s1376_s12, %s1376_s12, %s1377_s13  }
 0x3ac PF: > { %p1252_p1 = scmp.ge.s32.totalorder %s1373_s21, 2  ;;  %s990_s15 = sand.u32 1, %s1361_s18  }
 0x3ad   : > { %s991_s16 = scalar_lea.sflag [#allocation3], %s990_s15 }
 0x3ae   : > { %p1249_p2 = pnand %p1252_p1, %p1450_p6 }
 0x3b0   : > { %1356 = dma.done.wait (!%p1249_p2), %s991_s16, 2048  }
 0x3b1   : > { %1358 = vsyncadd (!%p1249_p2), %s991_s16, 4294965248  ;;  %p15_p3 = scmp.ge.s32.totalorder %s1433_s24, 4   ;;  %s1623_s18 = smov %s1365_s19 }
 0x3b2   : > { %s1624_s19 = smov %s1369_s20  ;;  %s1625_s20 = smov %s1444_s27 }
 0x3b3   : > { %s1626_s21 = smov %s1433_s24  ;;  %17 = sbr.rel (!%p15_p3) target bundleno = 3 (0x3), region = 75 }
 0x3ba   :  { %996 = vsyncpa [#allocation3], 1 }
 0x3bb   :  { %998 = vsyncpa [#allocation3 + $0x1], 1 }

</bundles_post_ra>
